<compile_context>
chip_gen: v6e
topology: v6e:2x2x1
jax: 0.10.0
libtpu: 0.0.40
codegen_flags: <defaults>
</compile_context>

<pallas_src>
import jax
import jax.numpy as jnp
from jax.experimental import pallas as pl
from jax.experimental.pallas import tpu as pltpu

HIDDEN = 128


def critic_kernel(s_ref, a_ref, w1s_ref, w1a_ref, b1_ref,
                  w2_ref, b2_ref, w3t_ref, b3_ref, o_ref):
    # Layer 1: the concat is fused as two matmuls against the split W1.
    h1 = (jnp.dot(s_ref[...], w1s_ref[...], preferred_element_type=jnp.float32)
          + jnp.dot(a_ref[...], w1a_ref[...], preferred_element_type=jnp.float32)
          + b1_ref[...])
    h1 = jnp.maximum(h1, 0.0)

    # Layer 2: 128x128 MXU matmul.
    h2 = jnp.dot(h1, w2_ref[...], preferred_element_type=jnp.float32) + b2_ref[...]
    h2 = jnp.maximum(h2, 0.0)

    # Layer 3 (output width 1): VPU multiply + lane reduction instead of an
    # N=1 MXU matmul; b3 is a scalar read from SMEM.
    q = jnp.sum(h2 * w3t_ref[...], axis=-1, keepdims=True) + b3_ref[0, 0]
    o_ref[...] = q


def critic_forward(state, action, params):
    """state: (B, state_dim) f32, action: (B, action_dim) f32 -> (B, 1) f32."""
    w1, b1, w2, b2, w3, b3 = params
    state = state.astype(jnp.float32)
    action = action.astype(jnp.float32)
    B, state_dim = state.shape
    _, action_dim = action.shape
    d_in = state_dim + action_dim

    # Split W1 so the concat happens "for free" inside the kernel.
    w1s = w1[:state_dim, :]
    w1a = w1[state_dim:, :]
    # W3 as a (1, 128) row for the VPU-reduction epilogue.
    w3t = w3.reshape(1, HIDDEN)
    # b3 as a (1, 1) scalar for SMEM.
    b3s = b3.reshape(1, 1)

    # Batch tiling: full-extent tile for small batches (no explicit padding;
    # Mosaic pads to vregs), 512-row tiles otherwise (multiple of 8 sublanes,
    # keeps the MXU pipelined while staying far below the VMEM limit).
    TB = B if B <= 512 else 512
    nb = pl.cdiv(B, TB)

    inv = lambda i: (0, 0)  # grid-invariant blocks (weights / biases)

    flops = 2 * B * (d_in * HIDDEN + HIDDEN * HIDDEN + HIDDEN)
    bytes_accessed = 4 * (B * d_in                       # state + action
                          + d_in * HIDDEN + HIDDEN       # W1 + b1
                          + HIDDEN * HIDDEN + HIDDEN     # W2 + b2
                          + HIDDEN + 1                   # W3 + b3
                          + B)                           # output

    out = pl.pallas_call(
        critic_kernel,
        out_shape=jax.ShapeDtypeStruct((B, 1), jnp.float32),
        grid=(nb,),
        in_specs=[
            pl.BlockSpec((TB, state_dim), lambda i: (i, 0)),
            pl.BlockSpec((TB, action_dim), lambda i: (i, 0)),
            pl.BlockSpec((state_dim, HIDDEN), inv),
            pl.BlockSpec((action_dim, HIDDEN), inv),
            pl.BlockSpec((1, HIDDEN), inv),
            pl.BlockSpec((HIDDEN, HIDDEN), inv),
            pl.BlockSpec((1, HIDDEN), inv),
            pl.BlockSpec((1, HIDDEN), inv),
            pl.BlockSpec(memory_space=pltpu.MemorySpace.SMEM),   # b3 scalar
        ],
        out_specs=pl.BlockSpec((TB, 1), lambda i: (i, 0)),
        compiler_params=pltpu.CompilerParams(
            dimension_semantics=("parallel",)),
        cost_estimate=pl.CostEstimate(
            flops=flops, transcendentals=0, bytes_accessed=bytes_accessed),
    )(state, action, w1s, w1a, b1, w2, b2, w3t, b3s)

    return out


def init_critic_params(key, state_dim, action_dim, hidden=HIDDEN):
    """Deterministic synthetic init (Kaiming-uniform-ish like nn.Linear)."""
    d_in = state_dim + action_dim
    k1, k2, k3, k4, k5, k6 = jax.random.split(key, 6)

    def lin(kw, kb, fan_in, fan_out):
        bound = 1.0 / jnp.sqrt(fan_in)
        w = jax.random.uniform(kw, (fan_in, fan_out), jnp.float32, -bound, bound)
        b = jax.random.uniform(kb, (1, fan_out), jnp.float32, -bound, bound)
        return w, b

    w1, b1 = lin(k1, k2, d_in, hidden)
    w2, b2 = lin(k3, k4, hidden, hidden)
    w3, b3 = lin(k5, k6, hidden, 1)
    return (w1, b1, w2, b2, w3, b3)


def critic_ref(state, action, params):
    """Pure-JAX reference of the PyTorch forward."""
    w1, b1, w2, b2, w3, b3 = params
    hp = jax.lax.Precision.HIGHEST
    x = jnp.concatenate([state, action], axis=1)
    x = jnp.maximum(jnp.dot(x, w1, precision=hp) + b1, 0.0)
    x = jnp.maximum(jnp.dot(x, w2, precision=hp) + b2, 0.0)
    return jnp.dot(x, w3, precision=hp) + b3


if __name__ == "__main__":
    key = jax.random.PRNGKey(0)
    k_s, k_a, k_p = jax.random.split(key, 3)

    batch, state_dim, action_dim = 2, 12, 4
    state = jax.random.normal(k_s, (batch, state_dim), jnp.float32)
    action = jax.random.normal(k_a, (batch, action_dim), jnp.float32)
    params = init_critic_params(k_p, state_dim, action_dim)

    q = critic_forward(state, action, params)
    q = jax.block_until_ready(q)

    q_ref = critic_ref(state, action, params)
    assert q.shape == (batch, 1), q.shape
    assert jnp.allclose(q, q_ref, atol=1e-4, rtol=1e-4), (q, q_ref)

    print("KERNEL_OK")
</pallas_src>

<mosaic_0001>
module attributes {stable_mosaic.version = 11 : i64} {
  func.func @critic_kernel(%arg0: i32, %arg1: memref<2x12xf32, #tpu.memory_space<vmem>>, %arg2: memref<2x4xf32, #tpu.memory_space<vmem>>, %arg3: memref<12x128xf32, #tpu.memory_space<vmem>>, %arg4: memref<4x128xf32, #tpu.memory_space<vmem>>, %arg5: memref<1x128xf32, #tpu.memory_space<vmem>>, %arg6: memref<128x128xf32, #tpu.memory_space<vmem>>, %arg7: memref<1x128xf32, #tpu.memory_space<vmem>>, %arg8: memref<1x128xf32, #tpu.memory_space<vmem>>, %arg9: memref<1x1xf32, #tpu.memory_space<smem>>, %arg10: memref<2x1xf32, #tpu.memory_space<vmem>>) attributes {dimension_semantics = [#tpu.dimension_semantics<parallel>], iteration_bounds = array<i64: 1>, scalar_prefetch = 0 : i64, scratch_operands = 0 : i64, tpu.core_type = #tpu.core_type<tc>, window_params = [{transform_indices = @transform_0, window_bounds = array<i64: 2, 12>}, {transform_indices = @transform_1, window_bounds = array<i64: 2, 4>}, {pipeline_mode = #tpu.pipeline_mode<synchronous>, transform_indices = @transform_2, window_bounds = array<i64: 12, 128>}, {pipeline_mode = #tpu.pipeline_mode<synchronous>, transform_indices = @transform_3, window_bounds = array<i64: 4, 128>}, {pipeline_mode = #tpu.pipeline_mode<synchronous>, transform_indices = @transform_4, window_bounds = array<i64: 1, 128>}, {pipeline_mode = #tpu.pipeline_mode<synchronous>, transform_indices = @transform_5, window_bounds = array<i64: 128, 128>}, {pipeline_mode = #tpu.pipeline_mode<synchronous>, transform_indices = @transform_6, window_bounds = array<i64: 1, 128>}, {pipeline_mode = #tpu.pipeline_mode<synchronous>, transform_indices = @transform_7, window_bounds = array<i64: 1, 128>}, {transform_indices = @transform_8, window_bounds = array<i64: 1, 1>}, {transform_indices = @transform_9, window_bounds = array<i64: 2, 1>}]} {
    %c0 = arith.constant 0 : index
    %c0_0 = arith.constant 0 : index
    %0 = vector.load %arg1[%c0, %c0_0] : memref<2x12xf32, #tpu.memory_space<vmem>>, vector<2x12xf32>
    %c0_1 = arith.constant 0 : index
    %c0_2 = arith.constant 0 : index
    %1 = vector.load %arg3[%c0_1, %c0_2] : memref<12x128xf32, #tpu.memory_space<vmem>>, vector<12x128xf32>
    %cst = arith.constant dense<0.000000e+00> : vector<2x128xf32>
    %2 = tpu.matmul %0, %1, %cst {dimension_numbers = #tpu.dot_dimension_numbers<[1], [0], [0], [1], [0, 0, 1, 1], [], []>} : vector<2x12xf32>, vector<12x128xf32>, vector<2x128xf32> -> vector<2x128xf32>
    %c0_3 = arith.constant 0 : index
    %c0_4 = arith.constant 0 : index
    %3 = vector.load %arg2[%c0_3, %c0_4] : memref<2x4xf32, #tpu.memory_space<vmem>>, vector<2x4xf32>
    %c0_5 = arith.constant 0 : index
    %c0_6 = arith.constant 0 : index
    %4 = vector.load %arg4[%c0_5, %c0_6] : memref<4x128xf32, #tpu.memory_space<vmem>>, vector<4x128xf32>
    %cst_7 = arith.constant dense<0.000000e+00> : vector<2x128xf32>
    %5 = tpu.matmul %3, %4, %cst_7 {dimension_numbers = #tpu.dot_dimension_numbers<[1], [0], [0], [1], [0, 0, 1, 1], [], []>} : vector<2x4xf32>, vector<4x128xf32>, vector<2x128xf32> -> vector<2x128xf32>
    %6 = arith.addf %2, %5 : vector<2x128xf32>
    %c0_8 = arith.constant 0 : index
    %c0_9 = arith.constant 0 : index
    %7 = vector.load %arg5[%c0_8, %c0_9] : memref<1x128xf32, #tpu.memory_space<vmem>>, vector<1x128xf32>
    %8 = vector.broadcast %7 : vector<1x128xf32> to vector<2x128xf32>
    %9 = arith.addf %6, %8 : vector<2x128xf32>
    %cst_10 = arith.constant 0.000000e+00 : f32
    %10 = vector.broadcast %cst_10 : f32 to vector<2x128xf32>
    %11 = arith.maximumf %9, %10 : vector<2x128xf32>
    %c0_11 = arith.constant 0 : index
    %c0_12 = arith.constant 0 : index
    %12 = vector.load %arg6[%c0_11, %c0_12] : memref<128x128xf32, #tpu.memory_space<vmem>>, vector<128x128xf32>
    %cst_13 = arith.constant dense<0.000000e+00> : vector<2x128xf32>
    %13 = tpu.matmul %11, %12, %cst_13 {dimension_numbers = #tpu.dot_dimension_numbers<[1], [0], [0], [1], [0, 0, 1, 1], [], []>} : vector<2x128xf32>, vector<128x128xf32>, vector<2x128xf32> -> vector<2x128xf32>
    %c0_14 = arith.constant 0 : index
    %c0_15 = arith.constant 0 : index
    %14 = vector.load %arg7[%c0_14, %c0_15] : memref<1x128xf32, #tpu.memory_space<vmem>>, vector<1x128xf32>
    %15 = vector.broadcast %14 : vector<1x128xf32> to vector<2x128xf32>
    %16 = arith.addf %13, %15 : vector<2x128xf32>
    %cst_16 = arith.constant 0.000000e+00 : f32
    %17 = vector.broadcast %cst_16 : f32 to vector<2x128xf32>
    %18 = arith.maximumf %16, %17 : vector<2x128xf32>
    %c0_17 = arith.constant 0 : index
    %c0_18 = arith.constant 0 : index
    %19 = vector.load %arg8[%c0_17, %c0_18] : memref<1x128xf32, #tpu.memory_space<vmem>>, vector<1x128xf32>
    %20 = vector.broadcast %19 : vector<1x128xf32> to vector<2x128xf32>
    %21 = arith.mulf %18, %20 : vector<2x128xf32>
    %cst_19 = arith.constant dense<0.000000e+00> : vector<2xf32>
    %22 = vector.multi_reduction <add>, %21, %cst_19 [1] : vector<2x128xf32> to vector<2xf32>
    %23 = vector.shape_cast %22 : vector<2xf32> to vector<2x1xf32>
    %c0_20 = arith.constant 0 : index
    %c0_21 = arith.constant 0 : index
    %24 = memref.load %arg9[%c0_20, %c0_21] : memref<1x1xf32, #tpu.memory_space<smem>>
    %25 = vector.broadcast %24 : f32 to vector<2x1xf32>
    %26 = arith.addf %23, %25 : vector<2x1xf32>
    %c0_22 = arith.constant 0 : index
    %c0_23 = arith.constant 0 : index
    %27 = vector.load %arg10[%c0_22, %c0_23] : memref<2x1xf32, #tpu.memory_space<vmem>>, vector<2x1xf32>
    tpu.vector_store %arg10[%c0_22, %c0_23], %26 {strides = array<i32>} : memref<2x1xf32, #tpu.memory_space<vmem>>, vector<2x1xf32>,
    return
  }
  func.func @transform_0(%arg0: i32) -> (i32, i32) {
    %c0_i32 = arith.constant 0 : i32
    %c0_i32_0 = arith.constant 0 : i32
    return %arg0, %c0_i32 : i32, i32
  }
  func.func @transform_1(%arg0: i32) -> (i32, i32) {
    %c0_i32 = arith.constant 0 : i32
    %c0_i32_0 = arith.constant 0 : i32
    return %arg0, %c0_i32 : i32, i32
  }
  func.func @transform_2(%arg0: i32) -> (i32, i32) {
    %c0_i32 = arith.constant 0 : i32
    %c0_i32_0 = arith.constant 0 : i32
    %c0_i32_1 = arith.constant 0 : i32
    return %c0_i32, %c0_i32_0 : i32, i32
  }
  func.func @transform_3(%arg0: i32) -> (i32, i32) {
    %c0_i32 = arith.constant 0 : i32
    %c0_i32_0 = arith.constant 0 : i32
    %c0_i32_1 = arith.constant 0 : i32
    return %c0_i32, %c0_i32_0 : i32, i32
  }
  func.func @transform_4(%arg0: i32) -> (i32, i32) {
    %c0_i32 = arith.constant 0 : i32
    %c0_i32_0 = arith.constant 0 : i32
    %c0_i32_1 = arith.constant 0 : i32
    return %c0_i32, %c0_i32_0 : i32, i32
  }
  func.func @transform_5(%arg0: i32) -> (i32, i32) {
    %c0_i32 = arith.constant 0 : i32
    %c0_i32_0 = arith.constant 0 : i32
    %c0_i32_1 = arith.constant 0 : i32
    return %c0_i32, %c0_i32_0 : i32, i32
  }
  func.func @transform_6(%arg0: i32) -> (i32, i32) {
    %c0_i32 = arith.constant 0 : i32
    %c0_i32_0 = arith.constant 0 : i32
    %c0_i32_1 = arith.constant 0 : i32
    return %c0_i32, %c0_i32_0 : i32, i32
  }
  func.func @transform_7(%arg0: i32) -> (i32, i32) {
    %c0_i32 = arith.constant 0 : i32
    %c0_i32_0 = arith.constant 0 : i32
    %c0_i32_1 = arith.constant 0 : i32
    return %c0_i32, %c0_i32_0 : i32, i32
  }
  func.func @transform_8(%arg0: i32) -> (i32, i32) {
    %c0_i32 = arith.constant 0 : i32
    %c0_i32_0 = arith.constant 0 : i32
    %c0_i32_1 = arith.constant 0 : i32
    return %c0_i32, %c0_i32_0 : i32, i32
  }
  func.func @transform_9(%arg0: i32) -> (i32, i32) {
    %c0_i32 = arith.constant 0 : i32
    %c0_i32_0 = arith.constant 0 : i32
    return %arg0, %c0_i32 : i32, i32
  }
}

</mosaic_0001>

<bundles_post_ra>
// kernel: tpu_custom_call.1
= control target key start
LH: loop header
LB: loop body
LE: loop exit
PB: predicated region body
PF: predicated region fallthrough
CT: control target
= control target key end

     0   :  { %15 = vsyncpa [#allocation4], 0  ;;  %s614_s0 = inlined_call_operand.vmem [shape: f32[2,12], index: 0, kind: input, shape index: {}]   ;;  %s615_s1 = inlined_call_operand.hbm [shape: f32[2,4], index: 1, kind: input, shape index: {}]   ;;  %s616_s2 = inlined_call_operand.hbm [shape: f32[12,128], index: 2, kind: input, shape index: {}]   ;;  %s617_s3 = inlined_call_operand.vmem [shape: f32[4,128], index: 3, kind: input, shape index: {}]   ;;  %s618_s4 = inlined_call_operand.vmem [shape: f32[1,128], index: 4, kind: input, shape index: {}]   ;;  %s619_s5 = inlined_call_operand.hbm [shape: f32[128,128], index: 5, kind: input, shape index: {}]   ;;  %s620_s6 = inlined_call_operand.vmem [shape: f32[1,128], index: 6, kind: input, shape index: {}]   ;;  %s621_s7 = inlined_call_operand.vmem [shape: f32[1,128], index: 7, kind: input, shape index: {}]   ;;  %s622_s8 = inlined_call_operand.<no memory space> [shape: f32[1,1], index: 8, kind: input, shape index: {}]   ;;  %s623_s9 = inlined_call_operand.vmem [shape: f32[2,1], index: 9, kind: output, shape index: {}]  }
   0x1   :  { %16 = vsyncpa [#allocation6], 0  ;;  %s505_s30 = smov [#allocation5]  }
   0x2   :  { %s34_s10 = sshll.u32 %s505_s30, 4  ;;  %s35_s10 = int_to_ptr.vmem [resolvable:$true] %s34_s10 }
   0x3   :  { %s449_s11 = scalar_lea.vmem %s35_s10, 256  ;;  %p454_p1 = scmp.lt.s32.totalorder %s35_s10, %s35_s10 }
   0x4   :  { %p450_p0 = scmp.ne.s32.totalorder %s35_s10, %s449_s11  ;;  %p455_p2 = scmp.lt.s32.totalorder %s449_s11, %s449_s11 }
   0x6   :  { %p456_p3 = por %p455_p2, %p454_p1 }
   0x8   :  { %p457_p4 = pnand %p456_p3, %p450_p0 }
   0xa   :  { %460 = shalt.err (!%p457_p4)
}
   0xb   :  { %s506_s12 = smov 128   ;;  %s507_s13 = smov 8  }
   0xc   :  { %40 = dma.hbm_to_vmem [thread:$0]  %s616_s2, 256, %s35_s10, [#allocation6], %s506_s12, %s506_s12, %s507_s13  }
   0xd   :  { %s508_s16 = smov [#allocation3]   ;;  %s509_s18 = smov [#allocation7]  }
   0xe   :  { %s25_s17 = sshll.u32 %s508_s16, 4  ;;  %s50_s19 = sshll.u32 %s509_s18, 4  ;;  %s26_s17 = int_to_ptr.vmem [resolvable:$true] %s25_s17  ;;  %s51_s19 = int_to_ptr.vmem [resolvable:$true] %s50_s19 }
   0xf   :  { %s469_s20 = scalar_lea.vmem %s26_s17, 32  ;;  %p474_p6 = scmp.lt.s32.totalorder %s26_s17, %s26_s17 }
  0x10   :  { %p470_p5 = scmp.ne.s32.totalorder %s26_s17, %s469_s20  ;;  %p475_p7 = scmp.lt.s32.totalorder %s469_s20, %s469_s20 }
  0x12   :  { %p476_p8 = por %p475_p7, %p474_p6 }
  0x14   :  { %p477_p9 = pnand %p476_p8, %p470_p5 }
  0x16   :  { %480 = shalt.err (!%p477_p9)
}
  0x17   :  { %28 = dma.hbm_to_vmem [thread:$0]  %s615_s1, 32, %s26_s17, [#allocation4]  }
  0x18   :  { %s489_s23 = scalar_lea.vmem %s51_s19, 2048  ;;  %p494_p11 = scmp.lt.s32.totalorder %s51_s19, %s51_s19 }
  0x19   :  { %p490_p10 = scmp.ne.s32.totalorder %s51_s19, %s489_s23  ;;  %p495_p12 = scmp.lt.s32.totalorder %s489_s23, %s489_s23 }
  0x1b   :  { %p496_p13 = por %p495_p12, %p494_p11 }
  0x1d   :  { %p497_p0 = pnand %p496_p13, %p490_p10 }
  0x1f   :  { %500 = shalt.err (!%p497_p0)
}
  0x20   :  { %56 = dma.hbm_to_vmem [thread:$0]  %s619_s5, 2048, %s51_s19, [#allocation6], %s506_s12, %s506_s12, %s507_s13  }
  0x21   :  { %501 = dma.done.wait [#allocation4], 32  }
  0x22   :  { %502 = vsyncadd [#allocation4], 4294967264 }
  0x23   :  { %503 = dma.done.wait [#allocation6], 2304  }
  0x24   :  { %504 = vsyncadd [#allocation6], 4294964992  ;;  %v510_v0 = vmov 0.0   ;;  %vm511_vm0 = vmmov 0   ;;  %vm81_vm1 = vcmask 1043456   ;;  %vm77_vm2 = vcmask 31744  }
  0x25   :  { %387 = vmatprep.subr.mxu1 %v510_v0  ;;  %389 = vmatprep.mubr.msk.f32.mxu1 %vm511_vm0, %v510_v0  ;;  %v76_v1 = vld [vmem:[%s617_s3] sm:$0xf]  ;;  %v74_v3 = vld [vmem:[#allocation5 + $0x8] sm:$0xf]  ;;  %vm155_vm3 = vcmask 97280   ;;  %v253_v9 = vld [vmem:[#allocation7 + $0x60] sm:$0xff]  ;;  %v348_v38 = vstv %s622_s8 }
  0x26   :  { %399 = vmatprep.subr.mxu0 %v510_v0  ;;  %431 = vmatprep.mubr.msk.f32.mxu0 %vm511_vm0, %v510_v0  ;;  %v75_v2 = vld [vmem:[#allocation3] sm:$0x3]  ;;  %v256_v4 = vld [vmem:[#allocation7 + $0x78] sm:$0xff]  ;;  %v73_v5 = vld [vmem:[#allocation5] sm:$0xff]  ;;  %vm343_vm4 = vcmask 1041408   ;;  %vm350_vm5 = vcmask 1024  }
  0x27   :  { %388 = vmatpush3.msk.msra.mxu1 %vm81_vm1, %v76_v1  ;;  %v72_v6 = vld [vmem:[%s614_s0] sm:$0x3]  ;;  %v255_v7 = vld [vmem:[#allocation7 + $0x70] sm:$0xff]  ;;  %400 = vmatpush3.msra.mxu0 %v256_v4  ;;  %v252_v10 = vld [vmem:[#allocation7 + $0x58] sm:$0xff] }
  0x28   :  { %390 = vmatmul.mubr.msk.f32.vlgmr.msra.gmra.mxu1 %vm77_vm2, %v75_v2  ;;  %392 = vmatprep.subr.mxu1 %v510_v0  ;;  %v254_v8 = vld [vmem:[#allocation7 + $0x68] sm:$0xff]  ;;  %v251_v11 = vld [vmem:[#allocation7 + $0x50] sm:$0xff]  ;;  %v249_v13 = vld [vmem:[#allocation7 + $0x40] sm:$0xff] }
  0x29   :  { %393 = vmatpush3.msk.msra.mxu1 %vm81_vm1, %v74_v3  ;;  %396 = vmatprep.mubr.msk.f32.mxu1 %vm511_vm0, %v510_v0  ;;  %v250_v12 = vld [vmem:[#allocation7 + $0x48] sm:$0xff]  ;;  %v248_v14 = vld [vmem:[#allocation7 + $0x38] sm:$0xff]  ;;  %v247_v15 = vld [vmem:[#allocation7 + $0x30] sm:$0xff] }
  0x2a   :  { %394 = vmatprep.subr.mxu1 %v510_v0  ;;  %401 = vmatprep.subr.mxu0 %v510_v0  ;;  %v246_v16 = vld [vmem:[#allocation7 + $0x28] sm:$0xff]  ;;  %v245_v17 = vld [vmem:[#allocation7 + $0x20] sm:$0xff]  ;;  %v244_v18 = vld [vmem:[#allocation7 + $0x18] sm:$0xff] }
  0x2b   :  { %395 = vmatpush3.msra.mxu1 %v73_v5  ;;  %402 = vmatpush3.msra.mxu0 %v255_v7  ;;  %v243_v19 = vld [vmem:[#allocation7 + $0x10] sm:$0xff]  ;;  %v242_v20 = vld [vmem:[#allocation7 + $0x8] sm:$0xff]  ;;  %v241_v21 = vld [vmem:[#allocation7] sm:$0xff] }
  0x2c   :  { %397 = vmatmul.mubr.msk.f32.vlgmr.msra.gmra.mxu1 %vm155_vm3, %v72_v6  ;;  %403 = vmatprep.subr.mxu0 %v510_v0  ;;  %v362_v25 = vld [vmem:[%s618_s4] ss:$0 sm:$0xff] }
  0x2d   :  { %404 = vmatpush3.msra.mxu0 %v254_v8  ;;  %v363_v30 = vld [vmem:[%s620_s6] ss:$0 sm:$0xff] }
  0x2e   :  { %405 = vmatprep.subr.mxu0 %v510_v0  ;;  %v364_v34 = vld [vmem:[%s621_s7] ss:$0 sm:$0xff] }
  0x2f   :  { %406 = vmatpush3.msra.mxu0 %v253_v9 }
  0x30   :  { %407 = vmatprep.subr.mxu0 %v510_v0 }
  0x31   :  { %408 = vmatpush3.msra.mxu0 %v252_v10 }
  0x32   :  { %409 = vmatprep.subr.mxu0 %v510_v0 }
  0x33   :  { %410 = vmatpush3.msra.mxu0 %v251_v11 }
  0x34   :  { %411 = vmatprep.subr.mxu0 %v510_v0 }
  0x35   :  { %412 = vmatpush3.msra.mxu0 %v250_v12 }
  0x36   :  { %413 = vmatprep.subr.mxu0 %v510_v0 }
  0x37   :  { %414 = vmatpush3.msra.mxu0 %v249_v13 }
  0x38   :  { %415 = vmatprep.subr.mxu0 %v510_v0 }
  0x39   :  { %416 = vmatpush3.msra.mxu0 %v248_v14 }
  0x3a   :  { %417 = vmatprep.subr.mxu0 %v510_v0 }
  0x3b   :  { %418 = vmatpush3.msra.mxu0 %v247_v15 }
  0x3c   :  { %419 = vmatprep.subr.mxu0 %v510_v0 }
  0x3d   :  { %420 = vmatpush3.msra.mxu0 %v246_v16 }
  0x3e   :  { %421 = vmatprep.subr.mxu0 %v510_v0 }
  0x3f   :  { %422 = vmatpush3.msra.mxu0 %v245_v17 }
  0x40   :  { %423 = vmatprep.subr.mxu0 %v510_v0 }
  0x41   :  { %424 = vmatpush3.msra.mxu0 %v244_v18 }
  0x42   :  { %425 = vmatprep.subr.mxu0 %v510_v0 }
  0x43   :  { %426 = vmatpush3.msra.mxu0 %v243_v19 }
  0x44   :  { %427 = vmatprep.subr.mxu0 %v510_v0 }
  0x45   :  { %428 = vmatpush3.msra.mxu0 %v242_v20 }
  0x46   :  { %429 = vmatprep.subr.mxu0 %v510_v0 }
  0x47   :  { %430 = vmatpush3.msra.mxu0 %v241_v21 }
  0xe8   :  { %v151_v22 = vpop.f32.mrf.mxu1 }
  0xea   :  { %v391_v23 = vpop.f32.mrf.mxu1 }
  0xec   :  { %v228_v24 = vpop.f32.mrf.mxu1 }
  0xed   :  { %v229_v26 = vadd.f32 %v228_v24, %v151_v22 }
  0xee   :  { %v398_v27 = vpop.f32.mrf.mxu1 }
  0xef   :  { %v239_v28 = vadd.f32 %v362_v25, %v229_v26 }
  0xf1   :  { %v240_v29 = vmax.f32 %v239_v28, 0.0 }
  0xf3   :  { %432 = vmatmul.mubr.f32.vlgmr.msra.gmra.mxu0 %v240_v29 }
 0x1b3   :  { %v330_v31 = vpop.f32.mrf.mxu0 }
 0x1b4   :  { %v331_v32 = vadd.f32 %v363_v30, %v330_v31 }
 0x1b5   :  { %v433_v33 = vpop.f32.mrf.mxu0 }
 0x1b6   :  { %v334_v35 = vmax.f32 %v331_v32, 0.0 }
 0x1b8   :  { %v342_v36 = vmul.f32 %v364_v34, %v334_v35 }
 0x1ba   :  { %v344_v37 = vsel %vm343_vm4, %v342_v36, 0.0 }
 0x1bb   :  { %345 = vadd.xlane.f32.xlu0 %v344_v37 }
 0x244   :  { %v346_v39 = vpop.xlane.xlu0 %345 }
 0x245   :  { %v349_v40 = vadd.f32 %v348_v38, %v346_v39 }
 0x247   :  { %351 = vst.msk [vmem:[%s623_s9] sm:$0x3] %vm350_vm5, %v349_v40 }
 0x248   :  { %356 = vsyncpa [#allocation4], 1 }
 0x249   :  { %357 = vsyncpa [#allocation6], 1 }

</bundles_post_ra>
